<compile_context>
chip_gen: v7x
topology: tpu7x:2x2x1
jax: 0.10.0
libtpu: 0.0.40
codegen_flags: <defaults>
</compile_context>

<pallas_src>
import jax
import jax.numpy as jnp
from jax.experimental import pallas as pl
from jax.experimental.pallas import tpu as pltpu


def encoder_gin_kernel(adj_hbm, pool_hbm, x0_hbm,        # pl.ANY (raw HBM refs)
                       w1_ref, w2_ref, vec_ref,          # streamed per layer
                       out_ref,                          # (G_pad, D) block of (G_pad, L*D)
                       adj_scr, pool_scr, x_scr, sem):   # scratch
    # One-time load of the resident blocks into single-buffered VMEM scratch.
    @pl.when(pl.program_id(0) == 0)
    def _():
        cp_adj = pltpu.make_async_copy(adj_hbm, adj_scr, sem.at[0])
        cp_pool = pltpu.make_async_copy(pool_hbm, pool_scr, sem.at[1])
        cp_x0 = pltpu.make_async_copy(x0_hbm, x_scr, sem.at[2])
        cp_adj.start(); cp_pool.start(); cp_x0.start()
        cp_adj.wait(); cp_pool.wait(); cp_x0.wait()

    x = x_scr[...]                       # bf16 (N, D) carried activation
    inv_n = 1.0 / x.shape[0]

    vec = vec_ref[...]                   # (4, D) f32: rows = b1, b2, gamma, beta
    b1 = vec[0:1, :]
    b2 = vec[1:2, :]
    gamma = vec[2:3, :]
    beta = vec[3:4, :]

    # --- GINConv aggregation, self term folded in: (I + A) @ x  (eps = 0) ---
    h = jnp.dot(adj_scr[...], x, preferred_element_type=jnp.float32)

    # --- MLP: Linear -> ReLU -> Linear (bf16 MXU operands, f32 accumulate) ---
    h = jnp.dot(h.astype(jnp.bfloat16), w1_ref[...],
                preferred_element_type=jnp.float32) + b1
    h = jnp.maximum(h, 0.0)
    h = jnp.dot(h.astype(jnp.bfloat16), w2_ref[...],
                preferred_element_type=jnp.float32) + b2

    # --- outer F.relu ---
    h = jnp.maximum(h, 0.0)

    # --- BatchNorm1d, single-pass batch stats fused into one scale/shift FMA ---
    s = jnp.sum(h, axis=0, keepdims=True)
    s2 = jnp.sum(h * h, axis=0, keepdims=True)
    mean = s * inv_n
    var = jnp.maximum(s2 * inv_n - mean * mean, 0.0)   # clamp f32 cancellation
    scale = gamma * jax.lax.rsqrt(var + 1e-5)
    shift = beta - mean * scale
    h = h * scale + shift

    # carry the activation (bf16) for the next layer
    h_bf = h.astype(jnp.bfloat16)
    x_scr[...] = h_bf

    # --- global_add_pool, written straight into this layer's (G_pad, D) slab ---
    out_ref[...] = jnp.dot(pool_scr[...], h_bf, preferred_element_type=jnp.float32)


def encoder_gin_forward(x, edge_index, batch, params, num_graphs):
    """Glue: densify graph structure, pad features, call the Pallas kernel."""
    w1, b1, w2, b2, gamma, beta = params
    num_layers, D, _ = w1.shape
    N = x.shape[0]
    G_pad = ((num_graphs + 7) // 8) * 8          # pad graph dim to a full sublane

    # dense adjacency with the GIN self-loop folded in: (I + A), adj[dst, src] += 1
    src, dst = edge_index[0], edge_index[1]
    adj_i = (jnp.zeros((N, N), jnp.float32).at[dst, src].add(1.0)
             + jnp.eye(N, dtype=jnp.float32)).astype(jnp.bfloat16)

    # pooling matrix (one-hot over graph id); 0/1 entries are exact in bf16
    pool = (batch[None, :] == jnp.arange(G_pad)[:, None]).astype(jnp.bfloat16)

    # zero-pad node features up to hidden dim D, cast for the MXU
    x_pad = (jnp.zeros((N, D), jnp.float32)
             .at[:, : x.shape[1]].set(x)).astype(jnp.bfloat16)

    # pack the four per-layer (1, D) vectors into one (L, 4, D) streamed block
    vec = jnp.concatenate([b1, b2, gamma, beta], axis=1)   # (L, 4, D) f32

    # explicit VMEM budget (resident scratch + double-buffered streamed blocks + slack)
    vmem_bytes = (
        N * N * 2 + G_pad * N * 2 + N * D * 2      # adj / pool / x_scr (bf16, single-buffered)
        + 2 * 2 * D * D * 2                        # w1, w2 streamed (2 buffers each, bf16)
        + 2 * 4 * D * 4                            # packed vec streamed (f32)
        + 2 * G_pad * D * 4                        # output block (f32)
        + 4 * N * D * 4                            # f32 intermediates headroom
    )
    vmem_limit = min(64 << 20, max(32 << 20, int(vmem_bytes * 1.5) + (8 << 20)))

    out = pl.pallas_call(
        encoder_gin_kernel,
        out_shape=jax.ShapeDtypeStruct((G_pad, num_layers * D), jnp.float32),
        grid=(num_layers,),
        in_specs=[
            pl.BlockSpec(memory_space=pl.ANY),                # adj (HBM, DMA'd once)
            pl.BlockSpec(memory_space=pl.ANY),                # pool (HBM, DMA'd once)
            pl.BlockSpec(memory_space=pl.ANY),                # x0  (HBM, DMA'd once)
            pl.BlockSpec((None, D, D), lambda l: (l, 0, 0)),  # w1, streamed per layer
            pl.BlockSpec((None, D, D), lambda l: (l, 0, 0)),  # w2, streamed per layer
            pl.BlockSpec((None, 4, D), lambda l: (l, 0, 0)),  # packed b1/b2/gamma/beta
        ],
        # write each layer's pooled block straight into its (G_pad, D) column slab
        out_specs=pl.BlockSpec((G_pad, D), lambda l: (0, l)),
        scratch_shapes=[
            pltpu.VMEM((N, N), jnp.bfloat16),       # adjacency (single-buffered)
            pltpu.VMEM((G_pad, N), jnp.bfloat16),   # pool matrix
            pltpu.VMEM((N, D), jnp.bfloat16),       # carried activation
            pltpu.SemaphoreType.DMA((3,)),
        ],
        compiler_params=pltpu.CompilerParams(
            dimension_semantics=("arbitrary",),     # layer axis is sequential
            vmem_limit_bytes=vmem_limit),
    )(adj_i, pool, x_pad,
      w1.astype(jnp.bfloat16), w2.astype(jnp.bfloat16), vec)

    # drop graph padding; layout is already (G, L*D) == torch.cat(xpool, dim=1)
    return out[:num_graphs]


def encoder_gin_reference(x, edge_index, batch, params, num_graphs):
    """Pure-JAX reference mirroring the kernel's bf16-matmul / f32-accumulate math."""
    w1, b1, w2, b2, gamma, beta = params
    num_layers, D, _ = w1.shape
    N = x.shape[0]
    src, dst = edge_index[0], edge_index[1]
    adj_i = (jnp.zeros((N, N), jnp.float32).at[dst, src].add(1.0)
             + jnp.eye(N, dtype=jnp.float32)).astype(jnp.bfloat16)
    pool = (batch[None, :] == jnp.arange(num_graphs)[:, None]).astype(jnp.bfloat16)
    h = (jnp.zeros((N, D), jnp.float32)
         .at[:, : x.shape[1]].set(x)).astype(jnp.bfloat16)
    w1b, w2b = w1.astype(jnp.bfloat16), w2.astype(jnp.bfloat16)
    outs = []
    for i in range(num_layers):
        z = jnp.dot(adj_i, h, preferred_element_type=jnp.float32)
        z = jnp.dot(z.astype(jnp.bfloat16), w1b[i],
                    preferred_element_type=jnp.float32) + b1[i]
        z = jnp.maximum(z, 0.0)
        z = jnp.dot(z.astype(jnp.bfloat16), w2b[i],
                    preferred_element_type=jnp.float32) + b2[i]
        z = jnp.maximum(z, 0.0)
        mean = jnp.mean(z, axis=0, keepdims=True)
        var = jnp.mean((z - mean) ** 2, axis=0, keepdims=True)
        z = (z - mean) * jax.lax.rsqrt(var + 1e-5) * gamma[i] + beta[i]
        h = z.astype(jnp.bfloat16)
        outs.append(jnp.dot(pool, h, preferred_element_type=jnp.float32))
    return jnp.concatenate(outs, axis=1)


def init_params(key, num_features, dim, num_layers):
    """Deterministic synthetic parameter init (not a checkpoint load)."""
    ks = jax.random.split(key, 6)
    # layer-0 Linear is (num_features -> dim); stored padded to (dim, dim)
    w1 = 0.1 * jax.random.normal(ks[0], (num_layers, dim, dim), jnp.float32)
    mask0 = (jnp.arange(dim) < num_features).astype(jnp.float32)[:, None]
    w1 = w1.at[0].set(w1[0] * mask0)  # zero out rows for padded input features
    b1 = 0.1 * jax.random.normal(ks[1], (num_layers, 1, dim), jnp.float32)
    w2 = 0.1 * jax.random.normal(ks[2], (num_layers, dim, dim), jnp.float32)
    b2 = 0.1 * jax.random.normal(ks[3], (num_layers, 1, dim), jnp.float32)
    gamma = 1.0 + 0.05 * jax.random.normal(ks[4], (num_layers, 1, dim), jnp.float32)
    beta = 0.05 * jax.random.normal(ks[5], (num_layers, 1, dim), jnp.float32)
    return (w1, b1, w2, b2, gamma, beta)


if __name__ == "__main__":
    # small synthetic graph batch: 32 nodes, 8 input features, hidden 128
    # (lane-aligned), 3 GIN layers, 3 graphs, 64 directed edges.
    N, num_features, dim, num_layers, num_graphs, E = 32, 8, 128, 3, 3, 64

    key = jax.random.PRNGKey(0)
    kx, ke1, ke2, kp = jax.random.split(key, 4)

    x = jax.random.normal(kx, (N, num_features), jnp.float32)
    edge_index = jnp.stack([
        jax.random.randint(ke1, (E,), 0, N),
        jax.random.randint(ke2, (E,), 0, N),
    ], axis=0)                                                      # (2, E) int32
    batch = jnp.sort(jax.random.randint(kp, (N,), 0, num_graphs))   # node -> graph id

    params = init_params(kp, num_features, dim, num_layers)

    out = encoder_gin_forward(x, edge_index, batch, params, num_graphs)
    out = jax.block_until_ready(out)

    ref = encoder_gin_reference(x, edge_index, batch, params, num_graphs)
    assert out.shape == (num_graphs, num_layers * dim)
    assert jnp.allclose(out, ref, atol=2e-2, rtol=2e-2), "mismatch vs reference"

    print("KERNEL_OK")
</pallas_src>

<mosaic_0001>
module attributes {stable_mosaic.version = 11 : i64} {
  func.func @encoder_gin_kernel(%arg0: i32, %arg1: memref<32x32xbf16, #tpu.memory_space<any>>, %arg2: memref<8x32xbf16, #tpu.memory_space<any>>, %arg3: memref<32x128xbf16, #tpu.memory_space<any>>, %arg4: memref<1x128x128xbf16, #tpu.memory_space<vmem>>, %arg5: memref<1x128x128xbf16, #tpu.memory_space<vmem>>, %arg6: memref<1x4x128xf32, #tpu.memory_space<vmem>>, %arg7: memref<8x128xf32, #tpu.memory_space<vmem>>, %arg8: memref<32x32xbf16, #tpu.memory_space<vmem>>, %arg9: memref<8x32xbf16, #tpu.memory_space<vmem>>, %arg10: memref<32x128xbf16, #tpu.memory_space<vmem>>, %arg11: memref<3x!tpu.dma_semaphore, #tpu.memory_space<semaphore_mem>>) attributes {dimension_semantics = [#tpu.dimension_semantics<arbitrary>], iteration_bounds = array<i64: 3>, scalar_prefetch = 0 : i64, scratch_operands = 4 : i64, tpu.core_type = #tpu.core_type<tc>, window_params = [{}, {}, {}, {transform_indices = @transform_3, window_bounds = array<i64: 1, 128, 128>}, {transform_indices = @transform_4, window_bounds = array<i64: 1, 128, 128>}, {transform_indices = @transform_5, window_bounds = array<i64: 1, 4, 128>}, {transform_indices = @transform_6, window_bounds = array<i64: 8, 128>}]} {
    %c0_i32 = arith.constant 0 : i32
    %0 = arith.cmpi eq, %arg0, %c0_i32 : i32
    %1 = arith.extui %0 : i1 to i32
    %c0_i32_0 = arith.constant 0 : i32
    %2 = arith.cmpi ne, %1, %c0_i32_0 : i32
    scf.if %2 {
      %c0_i32_30 = arith.constant 0 : i32
      %56 = tpu.memref_slice %arg11[%c0_i32_30] : memref<3x!tpu.dma_semaphore, #tpu.memory_space<semaphore_mem>> -> memref<1x!tpu.dma_semaphore, #tpu.memory_space<semaphore_mem>>
      %57 = tpu.memref_squeeze %56 : memref<1x!tpu.dma_semaphore, #tpu.memory_space<semaphore_mem>> -> memref<!tpu.dma_semaphore, #tpu.memory_space<semaphore_mem>>
      tpu.enqueue_dma source(%arg1 : memref<32x32xbf16, #tpu.memory_space<any>>) target(%arg8 : memref<32x32xbf16, #tpu.memory_space<vmem>>) target_semaphore(%57 : memref<!tpu.dma_semaphore, #tpu.memory_space<semaphore_mem>>)
      %c1_i32 = arith.constant 1 : i32
      %58 = tpu.memref_slice %arg11[%c1_i32] : memref<3x!tpu.dma_semaphore, #tpu.memory_space<semaphore_mem>> -> memref<1x!tpu.dma_semaphore, #tpu.memory_space<semaphore_mem>>
      %59 = tpu.memref_squeeze %58 : memref<1x!tpu.dma_semaphore, #tpu.memory_space<semaphore_mem>> -> memref<!tpu.dma_semaphore, #tpu.memory_space<semaphore_mem>>
      tpu.enqueue_dma source(%arg2 : memref<8x32xbf16, #tpu.memory_space<any>>) target(%arg9 : memref<8x32xbf16, #tpu.memory_space<vmem>>) target_semaphore(%59 : memref<!tpu.dma_semaphore, #tpu.memory_space<semaphore_mem>>)
      %c2_i32 = arith.constant 2 : i32
      %60 = tpu.memref_slice %arg11[%c2_i32] : memref<3x!tpu.dma_semaphore, #tpu.memory_space<semaphore_mem>> -> memref<1x!tpu.dma_semaphore, #tpu.memory_space<semaphore_mem>>
      %61 = tpu.memref_squeeze %60 : memref<1x!tpu.dma_semaphore, #tpu.memory_space<semaphore_mem>> -> memref<!tpu.dma_semaphore, #tpu.memory_space<semaphore_mem>>
      tpu.enqueue_dma source(%arg3 : memref<32x128xbf16, #tpu.memory_space<any>>) target(%arg10 : memref<32x128xbf16, #tpu.memory_space<vmem>>) target_semaphore(%61 : memref<!tpu.dma_semaphore, #tpu.memory_space<semaphore_mem>>)
      %c0_i32_31 = arith.constant 0 : i32
      %62 = tpu.memref_slice %arg11[%c0_i32_31] : memref<3x!tpu.dma_semaphore, #tpu.memory_space<semaphore_mem>> -> memref<1x!tpu.dma_semaphore, #tpu.memory_space<semaphore_mem>>
      %63 = tpu.memref_squeeze %62 : memref<1x!tpu.dma_semaphore, #tpu.memory_space<semaphore_mem>> -> memref<!tpu.dma_semaphore, #tpu.memory_space<semaphore_mem>>
      tpu.wait_dma2 semaphore(%63 : memref<!tpu.dma_semaphore, #tpu.memory_space<semaphore_mem>>) src(%arg1 : memref<32x32xbf16, #tpu.memory_space<any>>) dst(%arg8 : memref<32x32xbf16, #tpu.memory_space<vmem>>)
      %c1_i32_32 = arith.constant 1 : i32
      %64 = tpu.memref_slice %arg11[%c1_i32_32] : memref<3x!tpu.dma_semaphore, #tpu.memory_space<semaphore_mem>> -> memref<1x!tpu.dma_semaphore, #tpu.memory_space<semaphore_mem>>
      %65 = tpu.memref_squeeze %64 : memref<1x!tpu.dma_semaphore, #tpu.memory_space<semaphore_mem>> -> memref<!tpu.dma_semaphore, #tpu.memory_space<semaphore_mem>>
      tpu.wait_dma2 semaphore(%65 : memref<!tpu.dma_semaphore, #tpu.memory_space<semaphore_mem>>) src(%arg2 : memref<8x32xbf16, #tpu.memory_space<any>>) dst(%arg9 : memref<8x32xbf16, #tpu.memory_space<vmem>>)
      %c2_i32_33 = arith.constant 2 : i32
      %66 = tpu.memref_slice %arg11[%c2_i32_33] : memref<3x!tpu.dma_semaphore, #tpu.memory_space<semaphore_mem>> -> memref<1x!tpu.dma_semaphore, #tpu.memory_space<semaphore_mem>>
      %67 = tpu.memref_squeeze %66 : memref<1x!tpu.dma_semaphore, #tpu.memory_space<semaphore_mem>> -> memref<!tpu.dma_semaphore, #tpu.memory_space<semaphore_mem>>
      tpu.wait_dma2 semaphore(%67 : memref<!tpu.dma_semaphore, #tpu.memory_space<semaphore_mem>>) src(%arg3 : memref<32x128xbf16, #tpu.memory_space<any>>) dst(%arg10 : memref<32x128xbf16, #tpu.memory_space<vmem>>)
    } else {
    }
    %c0 = arith.constant 0 : index
    %c0_1 = arith.constant 0 : index
    %3 = vector.load %arg10[%c0, %c0_1] : memref<32x128xbf16, #tpu.memory_space<vmem>>, vector<32x128xbf16>
    %c0_2 = arith.constant 0 : index
    %c0_3 = arith.constant 0 : index
    %c0_4 = arith.constant 0 : index
    %4 = vector.load %arg6[%c0_2, %c0_3, %c0_4] : memref<1x4x128xf32, #tpu.memory_space<vmem>>, vector<1x4x128xf32>
    %5 = vector.shape_cast %4 : vector<1x4x128xf32> to vector<4x128xf32>
    %6 = vector.extract_strided_slice %5 {offsets = [0, 0], sizes = [1, 128], strides = [1, 1]} : vector<4x128xf32> to vector<1x128xf32>
    %7 = vector.extract_strided_slice %5 {offsets = [1, 0], sizes = [1, 128], strides = [1, 1]} : vector<4x128xf32> to vector<1x128xf32>
    %8 = vector.extract_strided_slice %5 {offsets = [2, 0], sizes = [1, 128], strides = [1, 1]} : vector<4x128xf32> to vector<1x128xf32>
    %9 = vector.extract_strided_slice %5 {offsets = [3, 0], sizes = [1, 128], strides = [1, 1]} : vector<4x128xf32> to vector<1x128xf32>
    %c0_5 = arith.constant 0 : index
    %c0_6 = arith.constant 0 : index
    %10 = vector.load %arg8[%c0_5, %c0_6] : memref<32x32xbf16, #tpu.memory_space<vmem>>, vector<32x32xbf16>
    %cst = arith.constant dense<0.000000e+00> : vector<32x128xf32>
    %11 = tpu.matmul %10, %3, %cst {dimension_numbers = #tpu.dot_dimension_numbers<[1], [0], [0], [1], [0, 0, 1, 1], [], []>} : vector<32x32xbf16>, vector<32x128xbf16>, vector<32x128xf32> -> vector<32x128xf32>
    %12 = arith.truncf %11 : vector<32x128xf32> to vector<32x128xbf16>
    %c0_7 = arith.constant 0 : index
    %c0_8 = arith.constant 0 : index
    %c0_9 = arith.constant 0 : index
    %13 = vector.load %arg4[%c0_7, %c0_8, %c0_9] : memref<1x128x128xbf16, #tpu.memory_space<vmem>>, vector<1x128x128xbf16>
    %14 = vector.shape_cast %13 : vector<1x128x128xbf16> to vector<128x128xbf16>
    %cst_10 = arith.constant dense<0.000000e+00> : vector<32x128xf32>
    %15 = tpu.matmul %12, %14, %cst_10 {dimension_numbers = #tpu.dot_dimension_numbers<[1], [0], [0], [1], [0, 0, 1, 1], [], []>} : vector<32x128xbf16>, vector<128x128xbf16>, vector<32x128xf32> -> vector<32x128xf32>
    %16 = vector.broadcast %6 : vector<1x128xf32> to vector<32x128xf32>
    %17 = arith.addf %15, %16 : vector<32x128xf32>
    %cst_11 = arith.constant 0.000000e+00 : f32
    %18 = vector.broadcast %cst_11 : f32 to vector<32x128xf32>
    %19 = arith.maximumf %17, %18 : vector<32x128xf32>
    %20 = arith.truncf %19 : vector<32x128xf32> to vector<32x128xbf16>
    %c0_12 = arith.constant 0 : index
    %c0_13 = arith.constant 0 : index
    %c0_14 = arith.constant 0 : index
    %21 = vector.load %arg5[%c0_12, %c0_13, %c0_14] : memref<1x128x128xbf16, #tpu.memory_space<vmem>>, vector<1x128x128xbf16>
    %22 = vector.shape_cast %21 : vector<1x128x128xbf16> to vector<128x128xbf16>
    %cst_15 = arith.constant dense<0.000000e+00> : vector<32x128xf32>
    %23 = tpu.matmul %20, %22, %cst_15 {dimension_numbers = #tpu.dot_dimension_numbers<[1], [0], [0], [1], [0, 0, 1, 1], [], []>} : vector<32x128xbf16>, vector<128x128xbf16>, vector<32x128xf32> -> vector<32x128xf32>
    %24 = vector.broadcast %7 : vector<1x128xf32> to vector<32x128xf32>
    %25 = arith.addf %23, %24 : vector<32x128xf32>
    %cst_16 = arith.constant 0.000000e+00 : f32
    %26 = vector.broadcast %cst_16 : f32 to vector<32x128xf32>
    %27 = arith.maximumf %25, %26 : vector<32x128xf32>
    %cst_17 = arith.constant dense<0.000000e+00> : vector<128xf32>
    %28 = vector.multi_reduction <add>, %27, %cst_17 [0] : vector<32x128xf32> to vector<128xf32>
    %29 = vector.shape_cast %28 : vector<128xf32> to vector<1x128xf32>
    %30 = arith.mulf %27, %27 : vector<32x128xf32>
    %cst_18 = arith.constant dense<0.000000e+00> : vector<128xf32>
    %31 = vector.multi_reduction <add>, %30, %cst_18 [0] : vector<32x128xf32> to vector<128xf32>
    %32 = vector.shape_cast %31 : vector<128xf32> to vector<1x128xf32>
    %cst_19 = arith.constant 3.125000e-02 : f32
    %33 = vector.broadcast %cst_19 : f32 to vector<1x128xf32>
    %34 = arith.mulf %29, %33 : vector<1x128xf32>
    %cst_20 = arith.constant 3.125000e-02 : f32
    %35 = vector.broadcast %cst_20 : f32 to vector<1x128xf32>
    %36 = arith.mulf %32, %35 : vector<1x128xf32>
    %37 = arith.mulf %34, %34 : vector<1x128xf32>
    %38 = arith.subf %36, %37 : vector<1x128xf32>
    %cst_21 = arith.constant 0.000000e+00 : f32
    %39 = vector.broadcast %cst_21 : f32 to vector<1x128xf32>
    %40 = arith.maximumf %38, %39 : vector<1x128xf32>
    %cst_22 = arith.constant 9.99999974E-6 : f32
    %41 = vector.broadcast %cst_22 : f32 to vector<1x128xf32>
    %42 = arith.addf %40, %41 : vector<1x128xf32>
    %43 = math.rsqrt %42 : vector<1x128xf32>
    %44 = arith.mulf %8, %43 : vector<1x128xf32>
    %45 = arith.mulf %34, %44 : vector<1x128xf32>
    %46 = arith.subf %9, %45 : vector<1x128xf32>
    %47 = vector.broadcast %44 : vector<1x128xf32> to vector<32x128xf32>
    %48 = arith.mulf %27, %47 : vector<32x128xf32>
    %49 = vector.broadcast %46 : vector<1x128xf32> to vector<32x128xf32>
    %50 = arith.addf %48, %49 : vector<32x128xf32>
    %51 = arith.truncf %50 : vector<32x128xf32> to vector<32x128xbf16>
    %c0_23 = arith.constant 0 : index
    %c0_24 = arith.constant 0 : index
    %52 = vector.load %arg10[%c0_23, %c0_24] : memref<32x128xbf16, #tpu.memory_space<vmem>>, vector<32x128xbf16>
    tpu.vector_store %arg10[%c0_23, %c0_24], %51 {strides = array<i32>} : memref<32x128xbf16, #tpu.memory_space<vmem>>, vector<32x128xbf16>,
    %c0_25 = arith.constant 0 : index
    %c0_26 = arith.constant 0 : index
    %53 = vector.load %arg9[%c0_25, %c0_26] : memref<8x32xbf16, #tpu.memory_space<vmem>>, vector<8x32xbf16>
    %cst_27 = arith.constant dense<0.000000e+00> : vector<8x128xf32>
    %54 = tpu.matmul %53, %51, %cst_27 {dimension_numbers = #tpu.dot_dimension_numbers<[1], [0], [0], [1], [0, 0, 1, 1], [], []>} : vector<8x32xbf16>, vector<32x128xbf16>, vector<8x128xf32> -> vector<8x128xf32>
    %c0_28 = arith.constant 0 : index
    %c0_29 = arith.constant 0 : index
    %55 = vector.load %arg7[%c0_28, %c0_29] : memref<8x128xf32, #tpu.memory_space<vmem>>, vector<8x128xf32>
    tpu.vector_store %arg7[%c0_28, %c0_29], %54 {strides = array<i32>} : memref<8x128xf32, #tpu.memory_space<vmem>>, vector<8x128xf32>,
    return
  }
  func.func @transform_3(%arg0: i32) -> (i32, i32, i32) {
    %c0_i32 = arith.constant 0 : i32
    %c0_i32_0 = arith.constant 0 : i32
    %c0_i32_1 = arith.constant 0 : i32
    return %arg0, %c0_i32, %c0_i32_0 : i32, i32, i32
  }
  func.func @transform_4(%arg0: i32) -> (i32, i32, i32) {
    %c0_i32 = arith.constant 0 : i32
    %c0_i32_0 = arith.constant 0 : i32
    %c0_i32_1 = arith.constant 0 : i32
    return %arg0, %c0_i32, %c0_i32_0 : i32, i32, i32
  }
  func.func @transform_5(%arg0: i32) -> (i32, i32, i32) {
    %c0_i32 = arith.constant 0 : i32
    %c0_i32_0 = arith.constant 0 : i32
    %c0_i32_1 = arith.constant 0 : i32
    return %arg0, %c0_i32, %c0_i32_0 : i32, i32, i32
  }
  func.func @transform_6(%arg0: i32) -> (i32, i32) {
    %c0_i32 = arith.constant 0 : i32
    %c0_i32_0 = arith.constant 0 : i32
    return %c0_i32, %arg0 : i32, i32
  }
}

</mosaic_0001>

<bundles_post_ra>
// kernel: tpu_custom_call.1
= control target key start
LH: loop header
LB: loop body
LE: loop exit
PB: predicated region body
PF: predicated region fallthrough
CT: control target
= control target key end

     0   :  { %s1662_s0 = inlined_call_operand.hbm [shape: bf16[32,32], index: 0, kind: input, shape index: {}]   ;;  %s1663_s1 = inlined_call_operand.hbm [shape: bf16[8,32], index: 1, kind: input, shape index: {}]   ;;  %s1664_s2 = inlined_call_operand.hbm [shape: bf16[32,128], index: 2, kind: input, shape index: {}]   ;;  %s1665_s3 = inlined_call_operand.hbm [shape: bf16[3,128,128], index: 3, kind: input, shape index: {}]   ;;  %s1666_s4 = inlined_call_operand.hbm [shape: bf16[3,128,128], index: 4, kind: input, shape index: {}]   ;;  %s1667_s5 = inlined_call_operand.vmem [shape: f32[3,4,128], index: 5, kind: input, shape index: {}]   ;;  %s1668_s6 = inlined_call_operand.hbm [shape: f32[8,384], index: 6, kind: output, shape index: {}]  }
   0x1   :  { %1673 = sst [smem:[#allocation26_spill]] %s1665_s3 }
   0x2   :  { %1674 = sst [smem:[#allocation27_spill]] %s1666_s4 }
   0x3   :  { %11 = vsyncpa [#allocation7], 0 }
   0x4   :  { %13 = vsyncpa [#allocation7 + $0x1], 0 }
   0x5   :  { %14 = vsyncpa [#allocation10], 0 }
   0x6   :  { %16 = vsyncpa [#allocation10 + $0x1], 0 }
   0x7   :  { %17 = vsyncpa [#allocation8], 0 }
   0x8   :  { %19 = vsyncpa [#allocation8 + $0x1], 0  ;;  %s1322_s21 = smov 0   ;;  %s1324_s22 = smov 0  }
   0x9   :  { %s1326_s23 = smov 0   ;;  %s1328_s24 = smov 0  }
   0xa LB: > { %s1343_s25 = sadd.s32 4294967295, %s1275_s24   ;;  %s845_s26 = sadd.s32 4294967294, %s1275_s24   ;;  %s1275_s24 = sphi %s1328_s24, %s1705_s24   ;;  %s1271_s23 = sphi %s1326_s23, %s1704_s23   ;;  %s1267_s22 = sphi %s1324_s22, %s1703_s22   ;;  %s1263_s21 = sphi %s1322_s21, %s1702_s21  }
   0xb   : > { %s1347_s27 = sadd.s32 1, %s1275_s24   ;;  %s32_s28 = sadd.s32 1, %s1271_s23 }
   0xc   : > { %s29_s29 = ssub.s32 %s1275_s24, %s1347_s27  ;;  %p39_p0 = scmp.ne.s32.totalorder %s1271_s23, %s1267_s22 }
   0xd   : > { %p30_p1 = scmp.eq.s32.totalorder %s29_s29, 0  ;;  %p40_p2 = scmp.eq.s32.totalorder %s1275_s24, 0 }
   0xe   : > { %p45_p3 = scmp.ne.s32.totalorder %s1267_s22, %s1263_s21  ;;  %p1669_p4 = scmp.eq.s32.totalorder %s1343_s25, 0 }
   0xf   : > { %s1359_s30 = scalar_select %p30_p1, %s1271_s23, %s32_s28  }
  0x10   : > { %p1361_p5 = por %p40_p2, %p39_p0  ;;  %p1367_p6 = por %p1669_p4, %p45_p3 }
  0x11   : > { %p121_p7 = scmp.eq.s32.totalorder %s1343_s25, 2  ;;  %p127_p8 = scmp.eq.s32.totalorder %s845_s26, 2 }
  0x12   : > { %s1676_s8 = scalar_select %p1367_p6, 1, 0 }
  0x13   : > { %p995_p9 = scmp.lt.s32.totalorder %s1275_s24, 3  ;;  %p1373_p10 = por %p121_p7, %p39_p0 }
  0x14   : > { %p1377_p11 = por %p127_p8, %p45_p3  ;;  %s1382_s11 = sand.u32 1, %s1271_s23  }
  0x15   : > { %s1677_s9 = scalar_select %p1373_p10, 1, 0 }
  0x16   : > { %s1678_s10 = scalar_select %p1377_p11, 1, 0 }
  0x17   : > { %s886_s12 = sshll.u32 %s1275_s24, 10  ;;  %s848_s13 = sshll.u32 %s1382_s11, 6 }
  0x18   : > { %s1679_s3 = sld [smem:[#allocation26_spill]]  ;;  %s151_s17 = scalar_lea.vmem [#allocation6], %s848_s13 }
  0x19   : > { %s158_s18 = sshll.u32 %s151_s17, 4  ;;  %p1397_p12 = pnand %p995_p9, %p1361_p5  ;;  %s1401_s18 = int_to_ptr.vmem [resolvable:$true] %s158_s18 }
  0x1a   : > { %s148_s20 = scalar_lea.sflag [#allocation7], %s1382_s11 }
  0x1b   : > { %p1057_p0 = pneg %p1397_p12 }
  0x1e   : > { %s1391_s16 = scalar_lea.hbm %s1679_s3, %s886_s12  ;;  %s1060_s7 = scalar_lea.hbm %s1679_s3, 3072 }
  0x1f   : > { %s1055_s26 = scalar_lea.hbm %s1391_s16, 1024  ;;  %p1061_p3 = scmp.lt.u32.totalorder %s1391_s16, %s1679_s3 }
  0x20   : > { %p1056_p13 = scmp.ne.s32.totalorder %s1391_s16, %s1055_s26  ;;  %p1062_p5 = scmp.lt.u32.totalorder %s1060_s7, %s1055_s26 }
  0x21   : > { %p1064_p8 = scmp.lt.u32.totalorder %s1055_s26, %s1391_s16 }
  0x22   : > { %p1058_p1 = pnand %p1057_p0, %p1056_p13  ;;  %p1063_p7 = por %p1062_p5, %p1061_p3 }
  0x24   : > { %p1059_p2 = pneg %p1058_p1  ;;  %p1065_p9 = por %p1064_p8, %p1063_p7 }
  0x26   : > { %p1066_p4 = pnand %p1065_p9, %p1059_p2 }
  0x28   : > { %1069 = shalt.err (!%p1066_p4)
}
  0x29   : > { %s1070_s17 = scalar_lea.vmem %s1401_s18, 1024  ;;  %s1277_s28 = smov [#allocation6]  }
  0x2a   : > { %p1071_p13 = scmp.ne.s32.totalorder %s1401_s18, %s1070_s17  ;;  %s1075_s29 = sshll.u32 %s1277_s28, 4  ;;  %s1076_s29 = int_to_ptr.vmem [resolvable:$false] %s1075_s29 }
  0x2b   : > { %s1077_s14 = scalar_lea.vmem %s1076_s29, 2048  ;;  %p1078_p10 = scmp.lt.s32.totalorder %s1401_s18, %s1076_s29 }
  0x2c   : > { %p1073_p1 = pnand %p1071_p13, %p1057_p0  ;;  %p1079_p3 = scmp.lt.s32.totalorder %s1077_s14, %s1070_s17 }
  0x2e   : > { %p1074_p11 = pneg %p1073_p1  ;;  %p1080_p5 = por %p1079_p3, %p1078_p10 }
  0x30   : > { %p1081_p7 = pnand %p1080_p5, %p1074_p11 }
  0x32   : > { %1084 = shalt.err (!%p1081_p7)
}
  0x33   : > { %s1671_s26 = smov 64   ;;  %s1279_s7 = smov 4  }
  0x34   : > { %987 = dma.hbm_to_vmem [thread:$0]  (!%p1397_p12), %s1391_s16, 1024, %s1401_s18, %s148_s20, %s1671_s26, %s1671_s26, %s1279_s7  }
  0x35   : > { %p854_p4 = scmp.ge.s32.totalorder %s1275_s24, 1  ;;  %p194_p10 = scmp.lt.s32.totalorder %s1275_s24, 4 }
  0x36   : > { %s1682_s4 = sld [smem:[#allocation27_spill]]  ;;  %s172_s14 = scalar_lea.vmem [#allocation9], %s848_s13 }
  0x37   : > { %p1436_p11 = pnand %p854_p4, %p194_p10  ;;  %s179_s3 = sshll.u32 %s172_s14, 4  ;;  %s1449_s3 = int_to_ptr.vmem [resolvable:$true] %s179_s3 }
  0x38   : > { %s169_s16 = scalar_lea.sflag [#allocation10], %s1382_s11 }
  0x3c   : > { %s1445_s29 = scalar_lea.hbm %s1682_s4, %s886_s12  ;;  %s1090_s12 = scalar_lea.hbm %s1682_s4, 3072 }
  0x3d   : > { %s1085_s18 = scalar_lea.hbm %s1445_s29, 1024  ;;  %p1091_p13 = scmp.lt.u32.totalorder %s1445_s29, %s1682_s4 }
  0x3e   : > { %p1086_p2 = scmp.ne.s32.totalorder %s1445_s29, %s1085_s18  ;;  %p1092_p1 = scmp.lt.u32.totalorder %s1090_s12, %s1085_s18 }
  0x3f   : > { %p1094_p5 = scmp.lt.u32.totalorder %s1085_s18, %s1445_s29 }
  0x40   : > { %p1088_p8 = pnand %p1086_p2, %p1057_p0  ;;  %p1093_p3 = por %p1092_p1, %p1091_p13 }
  0x42   : > { %p1089_p9 = pneg %p1088_p8  ;;  %p1095_p7 = por %p1094_p5, %p1093_p3 }
  0x44   : > { %p1096_p4 = pnand %p1095_p7, %p1089_p9 }
  0x46   : > { %1099 = shalt.err (!%p1096_p4)
}
  0x47   : > { %s1100_s13 = scalar_lea.vmem %s1449_s3, 1024  ;;  %s1280_s14 = smov [#allocation9]  }
  0x48   : > { %p1101_p10 = scmp.ne.s32.totalorder %s1449_s3, %s1100_s13  ;;  %s1105_s20 = sshll.u32 %s1280_s14, 4  ;;  %s1106_s20 = int_to_ptr.vmem [resolvable:$false] %s1105_s20 }
  0x49   : > { %s1107_s26 = scalar_lea.vmem %s1106_s20, 2048  ;;  %p1108_p6 = scmp.lt.s32.totalorder %s1449_s3, %s1106_s20 }
  0x4a   : > { %p1103_p2 = pnand %p1101_p10, %p1057_p0  ;;  %p1109_p13 = scmp.lt.s32.totalorder %s1107_s26, %s1100_s13 }
  0x4c   : > { %p1104_p8 = pneg %p1103_p2  ;;  %p1110_p1 = por %p1109_p13, %p1108_p6 }
  0x4e   : > { %p1111_p3 = pnand %p1110_p1, %p1104_p8 }
  0x50   : > { %1114 = shalt.err (!%p1111_p3)
}
  0x51   : > { %s1683_s18 = smov 64   ;;  %198 = sbr.rel (%p1436_p11) target bundleno = 1121 (0x461), region = 32 }
  0x52   : > { %990 = dma.hbm_to_vmem [thread:$0]  (!%p1397_p12), %s1445_s29, 1024, %s1449_s3, %s169_s16, %s1683_s18, %s1683_s18, %s1279_s7  }
  0x53   : > { %s1483_s17 = sand.u32 (!%p1436_p11), 1, %s1267_s22   ;;  %p1684_p6 = scmp.ne.s32.totalorder (!%p1436_p11), %s1676_s8, 0 }
  0x54   : > { %s855_s12 = sshll.u32 (!%p1436_p11), %s1483_s17, 6  ;;  %s201_s28 = scalar_lea.sflag (!%p1436_p11), [#allocation7], %s1483_s17 }
  0x55   : > { %s1487_s19 = scalar_lea.vmem (!%p1436_p11), [#allocation6], %s855_s12 }
  0x58   : > { %1238 = dma.done.wait (%p1684_p6), %s201_s28, 1024  }
  0x59   : > { %1240 = vsyncadd (%p1684_p6), %s201_s28, 4294966272  ;;  %s210_s3 = scalar_lea.sflag [#allocation10], %s1483_s17  ;;  %s1494_s11 = scalar_lea.vmem [#allocation9], %s855_s12 }
  0x5a   : > { %1242 = dma.done.wait (%p1684_p6), %s210_s3, 1024  }
  0x5b   : > { %1244 = vsyncadd (%p1684_p6), %s210_s3, 4294966272  ;;  %p245_p12 = scmp.lt.s32.totalorder %s1343_s25, 2  ;;  %s1281_s16 = smov [#allocation2]  }
  0x5c   : > { %s261_s13 = sshll.u32 %s1281_s16, 4  ;;  %s1115_s8 = scalar_lea.hbm %s1662_s0, 256  ;;  %s262_s13 = int_to_ptr.vmem [resolvable:$true] %s261_s13 }
  0x5d   : > { %s246_s15 = scalar_select %p245_p12, %s1343_s25, 2 }
  0x5e   : > { %p1116_p0 = scmp.ne.s32.totalorder %s1662_s0, %s1115_s8  ;;  %p1685_p11 = scmp.eq.s32.totalorder %s1343_s25, 0 }
  0x5f   : > { %s858_s29 = sshll.u32 %s246_s15, 2  ;;  %p1121_p7 = scmp.lt.u32.totalorder %s1115_s8, %s1662_s0 }
  0x60   : > { %s1506_s26 = scalar_lea.vmem %s1667_s5, %s858_s29  ;;  %p1117_p9 = pnand %p1116_p0, %p1685_p11 }
  0x62   : > { %p1118_p5 = pneg %p1117_p9 }
  0x64   : > { %p1123_p4 = pnand %p1121_p7, %p1118_p5 }
  0x66   : > { %1126 = shalt.err (!%p1123_p4)  }
  0x67   : > { %s1127_s29 = scalar_lea.vmem %s262_s13, 256  ;;  %p1686_p2 = pmov %p1685_p11 }
  0x68   : > { %p1128_p10 = scmp.ne.s32.totalorder %s262_s13, %s1127_s29  ;;  %p1134_p1 = scmp.lt.s32.totalorder %s262_s13, %s262_s13 }
  0x69   : > { %p1135_p3 = scmp.lt.s32.totalorder %s1127_s29, %s1127_s29 }
  0x6a   : > { %p1129_p8 = pnand %p1128_p10, %p1686_p2 }
  0x6b   : > { %p1136_p6 = por %p1135_p3, %p1134_p1 }
  0x6c   : > { %p1130_p13 = pneg %p1129_p8 }
  0x6e   : > { %p1137_p12 = pnand %p1136_p6, %p1130_p13 }
  0x70   : > { %1140 = shalt.err (!%p1137_p12)  }
  0x71   : > { %p1687_p0 = pmov %p1686_p2  ;;  %s1282_s7 = smov [#allocation3]  }
  0x72   : > { %s273_s20 = sshll.u32 %s1282_s7, 4  ;;  %s1283_s18 = smov [#allocation4]   ;;  %s274_s20 = int_to_ptr.vmem [resolvable:$true] %s273_s20 }
  0x73   : > { %976 = dma.hbm_to_vmem [thread:$0]  (%p1687_p0), %s1662_s0, 256, %s262_s13, [#allocation5] }
  0x74   : > { %s285_s12 = sshll.u32 %s1283_s18, 4  ;;  %s1141_s3 = scalar_lea.hbm %s1663_s1, 64  ;;  %s286_s12 = int_to_ptr.vmem [resolvable:$true] %s285_s12 }
  0x75   : > { %p1142_p11 = scmp.ne.s32.totalorder %s1663_s1, %s1141_s3  ;;  %p1688_p9 = pmov %p1687_p0 }
  0x76   : > { %p1147_p4 = scmp.lt.u32.totalorder %s1141_s3, %s1663_s1 }
  0x77   : > { %p1143_p5 = pnand %p1142_p11, %p1688_p9 }
  0x79   : > { %p1144_p7 = pneg %p1143_p5 }
  0x7b   : > { %p1149_p10 = pnand %p1147_p4, %p1144_p7 }
  0x7d   : > { %1152 = shalt.err (!%p1149_p10)  }
  0x7e   : > { %s1153_s13 = scalar_lea.vmem %s274_s20, 64  ;;  %p1689_p8 = pmov %p1687_p0 }
  0x7f   : > { %p1154_p2 = scmp.ne.s32.totalorder %s274_s20, %s1153_s13  ;;  %p1160_p3 = scmp.lt.s32.totalorder %s274_s20, %s274_s20 }
  0x80   : > { %p1161_p6 = scmp.lt.s32.totalorder %s1153_s13, %s1153_s13 }
  0x81   : > { %p1155_p13 = pnand %p1154_p2, %p1689_p8 }
  0x82   : > { %p1162_p12 = por %p1161_p6, %p1160_p3 }
  0x83   : > { %p1156_p1 = pneg %p1155_p13 }
  0x85   : > { %p1163_p0 = pnand %p1162_p12, %p1156_p1 }
  0x87   : > { %1166 = shalt.err (!%p1163_p0)  }
  0x88   : > { %p1690_p11 = pmov %p1689_p8  ;;  %s1167_s8 = scalar_lea.hbm %s1664_s2, 256 }
  0x89   : > { %p1168_p9 = scmp.ne.s32.totalorder %s1664_s2, %s1167_s8  ;;  %p1691_p5 = pmov %p1689_p8 }
  0x8a   : > { %977 = dma.hbm_to_vmem [thread:$0]  (%p1690_p11), %s1663_s1, 64, %s274_s20, [#allocation5 + $0x1] }
  0x8b   : > { %p1169_p7 = pnand %p1168_p9, %p1691_p5  ;;  %p1173_p10 = scmp.lt.u32.totalorder %s1167_s8, %s1664_s2 }
  0x8d   : > { %p1170_p4 = pneg %p1169_p7 }
  0x8f   : > { %p1175_p2 = pnand %p1173_p10, %p1170_p4 }
  0x91   : > { %1178 = shalt.err (!%p1175_p2)  }
  0x92   : > { %s1179_s16 = scalar_lea.vmem %s286_s12, 256  ;;  %p1692_p13 = pmov %p1691_p5 }
  0x93   : > { %p1180_p8 = scmp.ne.s32.totalorder %s286_s12, %s1179_s16  ;;  %p1186_p6 = scmp.lt.s32.totalorder %s286_s12, %s286_s12 }
  0x94   : > { %p1187_p12 = scmp.lt.s32.totalorder %s1179_s16, %s1179_s16 }
  0x95   : > { %p1181_p1 = pnand %p1180_p8, %p1692_p13 }
  0x96   : > { %p1188_p0 = por %p1187_p12, %p1186_p6 }
  0x97   : > { %p1182_p3 = pneg %p1181_p1 }
  0x99   : > { %p1189_p11 = pnand %p1188_p0, %p1182_p3 }
  0x9b   : > { %1192 = shalt.err (!%p1189_p11)  }
  0x9c   : > { %p1693_p9 = pmov %p1691_p5  ;;  %s1694_s14 = sshll.u32 %s1483_s17, 3 }
  0x9d   : > { %s1564_s7 = scalar_lea.vmem [#allocation11], %s1694_s14 }
  0x9e   : > { %978 = dma.hbm_to_vmem [thread:$0]  (%p1693_p9), %s1664_s2, 256, %s286_s12, [#allocation5 + $0x2] }
  0x9f   : > { %1246 = dma.done.wait (%p1691_p5), [#allocation5], 256  ;;  %p1695_p7 = pmov %p1691_p5 }
  0xa0   : > { %p1696_p4 = pmov %p1691_p5 }
  0xa1   : > { %1248 = vsyncadd (%p1695_p7), [#allocation5], 4294967040 }
  0xa2   : > { %1250 = dma.done.wait (%p1696_p4), [#allocation5 + $0x1], 64  ;;  %p1697_p10 = pmov %p1696_p4 }
  0xa3   : > { %p1698_p2 = pmov %p1696_p4 }
  0xa4   : > { %1252 = vsyncadd (%p1697_p10), [#allocation5 + $0x1], 4294967232 }
  0xa5   : > { %1254 = dma.done.wait (%p1698_p2), [#allocation5 + $0x2], 256  ;;  %p1699_p8 = pmov %p1698_p2 }
  0xa6   : > { %vm304_vm0 = vcmask 261120   ;;  %v299_v0 = vld [vmem:[#allocation4] sm:$0xff]  ;;  %v300_v1 = vld [vmem:[#allocation4 + $0x8] sm:$0xff]  ;;  %v1037_v3 = vld [vmem:[%s1487_s19] sm:$0xff]   ;;  %v378_v26 = vlaneseq  ;;  %v1284_v45 = vmov 0.0   ;;  %vm1285_vm1 = vmmov 0  }
  0xa7   : > { %1256 = vsyncadd (%p1699_p8), [#allocation5 + $0x2], 4294967040  ;;  %v302_v2 = vld [vmem:[#allocation2] sm:$0xff]  ;;  %915 = vmatprep.subr.bf16.mxu0 %v299_v0  ;;  %v1038_v4 = vld [vmem:[%s1487_s19 + $0x8] sm:$0xff]   ;;  %923 = vmatprep.subr.bf16.mxu1 %v1037_v3  ;;  %s707_s18 = scalar_lea.sflag [#allocation8], %s1483_s17  ;;  %p1700_p1 = scmp.ne.s32.totalorder %s1677_s9, 0 }
  0xa8   : > { %919 = vmatprep.mubr.msk.bf16.mxu0 %vm304_vm0, %v302_v2  ;;  %916 = vmatpush3.bf16.msra.mxu0 %v299_v0  ;;  %v303_v5 = vld [vmem:[#allocation2 + $0x8] sm:$0xff]  ;;  %v1039_v6 = vld [vmem:[%s1487_s19 + $0x10] sm:$0xff]   ;;  %v1040_v7 = vld [vmem:[%s1487_s19 + $0x18] sm:$0xff]   ;;  %v1596_v27 = vshrl.u32 %v378_v26, 7 }
  0xa9   : > { %917 = vmatprep.subr.bf16.mxu0 %v300_v1  ;;  %924 = vmatpush3.bf16.msra.mxu1 %v1037_v3  ;;  %v1041_v8 = vld [vmem:[%s1487_s19 + $0x20] sm:$0xff]   ;;  %v1042_v9 = vld [vmem:[%s1487_s19 + $0x28] sm:$0xff]   ;;  %v1043_v10 = vld [vmem:[%s1487_s19 + $0x30] sm:$0xff]  }
  0xaa   : > { %925 = vmatprep.subr.bf16.mxu1 %v1038_v4  ;;  %v1044_v11 = vld [vmem:[%s1487_s19 + $0x38] sm:$0xff]   ;;  %v1045_v12 = vld [vmem:[%s1494_s11] sm:$0xff]   ;;  %v1046_v13 = vld [vmem:[%s1494_s11 + $0x8] sm:$0xff]   ;;  %v380_v28 = vsub.s32 0, %v1596_v27  ;;  %v503_v46 = vsub.s32 1, %v1596_v27  ;;  %s880_s19 = sshll.u32 %s1343_s25, 7 }
  0xab   : > { %v1047_v14 = vld [vmem:[%s1494_s11 + $0x10] sm:$0xff]   ;;  %v1048_v15 = vld [vmem:[%s1494_s11 + $0x18] sm:$0xff]   ;;  %v1049_v16 = vld [vmem:[%s1494_s11 + $0x20] sm:$0xff]   ;;  %s1618_s4 = scalar_lea.hbm %s1668_s6, %s880_s19  ;;  %s1286_s25 = smov [#allocation11]  }
  0xac   : > { %918 = vmatpush3.bf16.msra.mxu0 %v300_v1  ;;  %v1050_v17 = vld [vmem:[%s1494_s11 + $0x28] sm:$0xff]   ;;  %v1051_v24 = vld [vmem:[%s1494_s11 + $0x30] sm:$0xff]   ;;  %v1052_v25 = vld [vmem:[%s1494_s11 + $0x38] sm:$0xff]   ;;  %s720_s11 = sshll.u32 %s1564_s7, 4  ;;  %s1197_s28 = sshll.u32 %s1286_s25, 4  ;;  %s1620_s11 = int_to_ptr.vmem [resolvable:$true] %s720_s11  ;;  %s1198_s28 = int_to_ptr.vmem [resolvable:$false] %s1197_s28 }
  0xad   : > { %926 = vmatpush3.bf16.msra.mxu1 %v1038_v4  ;;  %943 = vmatprep.subr.bf16.mxu0 %v1045_v12  ;;  %v1600_v29 = vld [vmem:[%s1506_s26] sm:$0xf]  ;;  %s1193_s8 = scalar_lea.vmem %s1620_s11, 128  ;;  %s1199_s3 = scalar_lea.vmem %s1198_s28, 256 }
  0xae   : > { %927 = vmatprep.subr.bf16.mxu1 %v1039_v6  ;;  %v381_v30 = vrot.slane %v1600_v29, %v380_v28  ;;  %v504_v47 = vrot.slane %v1600_v29, %v503_v46  ;;  %p1194_p13 = scmp.ne.s32.totalorder %s1620_s11, %s1193_s8  ;;  %p1200_p12 = scmp.lt.s32.totalorder %s1620_s11, %s1198_s28 }
  0xaf   : > { %920 = vmatmul.mubr.msk.bf16.vlgmr.msra.gmra.mrb[0].mxu0 %vm304_vm0, %v303_v5  ;;  %p1201_p0 = scmp.lt.s32.totalorder %s1199_s3, %s1193_s8 }
  0xb0   : > { %944 = vmatpush3.bf16.msra.mxu0 %v1045_v12  ;;  %p1195_p3 = pnand %p1194_p13, %p1700_p1 }
  0xb1   : > { %928 = vmatpush3.bf16.msra.mxu1 %v1039_v6  ;;  %945 = vmatprep.subr.bf16.mxu0 %v1046_v13  ;;  %p1202_p11 = por %p1201_p0, %p1200_p12 }
  0xb2   : > { %929 = vmatprep.subr.bf16.mxu1 %v1040_v7  ;;  %p1196_p6 = pneg %p1195_p3 }
  0xb4   : > { %946 = vmatpush3.bf16.msra.mxu0 %v1046_v13  ;;  %p1203_p9 = pnand %p1202_p11, %p1196_p6 }
  0xb5   : > { %930 = vmatpush3.bf16.msra.mxu1 %v1040_v7  ;;  %947 = vmatprep.subr.bf16.mxu0 %v1047_v14 }
  0xb6   : > { %931 = vmatprep.subr.bf16.mxu1 %v1041_v8 }
  0xb8   : > { %948 = vmatpush3.bf16.msra.mxu0 %v1047_v14 }
  0xb9   : > { %932 = vmatpush3.bf16.msra.mxu1 %v1041_v8  ;;  %949 = vmatprep.subr.bf16.mxu0 %v1048_v15 }
  0xba   : > { %933 = vmatprep.subr.bf16.mxu1 %v1042_v9 }
  0xbc   : > { %950 = vmatpush3.bf16.msra.mxu0 %v1048_v15 }
  0xbd   : > { %934 = vmatpush3.bf16.msra.mxu1 %v1042_v9  ;;  %951 = vmatprep.subr.bf16.mxu0 %v1049_v16 }
  0xbe   : > { %935 = vmatprep.subr.bf16.mxu1 %v1043_v10 }
  0xc0   : > { %952 = vmatpush3.bf16.msra.mxu0 %v1049_v16 }
  0xc1   : > { %936 = vmatpush3.bf16.msra.mxu1 %v1043_v10  ;;  %953 = vmatprep.subr.bf16.mxu0 %v1050_v17 }
  0xc2   : > { %937 = vmatprep.subr.bf16.mxu1 %v1044_v11 }
  0xc4   : > { %954 = vmatpush3.bf16.msra.mxu0 %v1050_v17 }
  0xc5   : > { %938 = vmatpush3.bf16.msra.mxu1 %v1044_v11  ;;  %955 = vmatprep.subr.bf16.mxu0 %v1051_v24 }
  0xc6   : > { %963 = vmatprep.subr.bf16.mxu1 %v1284_v45 }
  0xc8   : > { %956 = vmatpush3.bf16.msra.mxu0 %v1051_v24  ;;  %v643_v24 = vsub.s32 2, %v1596_v27 }
  0xc9   : > { %957 = vmatprep.subr.bf16.mxu0 %v1052_v25 }
  0xcc   : > { %958 = vmatpush3.bf16.msra.mxu0 %v1052_v25 }
 0x182   : > { %v921_v18 = vpop.f32.mrb[0].mxu0 }
 0x183   : > { %v345_v19 = vpop.f32.mrb[1].mxu0 }
 0x184   : > { %v922_v20 = vpop.f32.mrb[2].mxu0 }
 0x185   : > { %v361_v21 = vpack.c.bf16 %v922_v20, %v921_v18  ;;  %v348_v22 = vpop.f32.mrb[3].mxu0 }
 0x186   : > { %v360_v23 = vpack.c.bf16 %v348_v22, %v345_v19 }
 0x188   : > { %939 = vmatprep.mubr.bf16.mxu1 %v360_v23 }
 0x189   : > { %940 = vmatmul.mubr.bf16.vlgmr.msra.gmra.mrb[0].mxu1 %v361_v21 }
 0x18a   : > { %967 = vmatprep.mubr.msk.bf16.mxu1 %vm1285_vm1, %v1284_v45 }
 0x25c   : > { %v941_v31 = vpop.f32.mrb[0].mxu1 }
 0x25d   : > { %v473_v32 = vadd.f32 %v941_v31, %v381_v30  ;;  %v464_v33 = vpop.f32.mrb[1].mxu1  ;;  %v651_v31 = vsub.s32 3, %v1596_v27  ;;  %v661_v27 = vld [vmem:[#allocation3] sm:$0xf] }
 0x25e   : > { %v465_v34 = vadd.f32 %v464_v33, %v381_v30  ;;  %v942_v35 = vpop.f32.mrb[2].mxu1 }
 0x25f   : > { %v476_v36 = vadd.f32 %v942_v35, %v381_v30  ;;  %v467_v37 = vpop.f32.mrb[3].mxu1  ;;  %v481_v39 = vmax.f32 %v473_v32, 0.0 }
 0x260   : > { %v468_v38 = vadd.f32 %v467_v37, %v381_v30  ;;  %v479_v41 = vmax.f32 %v465_v34, 0.0 }
 0x261   : > { %v482_v40 = vmax.f32 %v476_v36, 0.0 }
 0x262   : > { %v480_v42 = vmax.f32 %v468_v38, 0.0 }
 0x263   : > { %v484_v43 = vpack.c.bf16 %v482_v40, %v481_v39 }
 0x264   : > { %v483_v44 = vpack.c.bf16 %v480_v42, %v479_v41 }
 0x266   : > { %959 = vmatprep.mubr.bf16.mxu0 %v483_v44 }
 0x267   : > { %960 = vmatmul.mubr.bf16.vlgmr.msra.gmra.mrb[4].mxu0 %v484_v43 }
 0x33a   : > { %v961_v48 = vpop.f32.mrb[4].mxu0 }
 0x33b   : > { %v587_v49 = vpop.f32.mrb[5].mxu0  ;;  %v596_v50 = vadd.f32 %v961_v48, %v504_v47 }
 0x33c   : > { %v588_v51 = vadd.f32 %v587_v49, %v504_v47  ;;  %v962_v52 = vpop.f32.mrb[6].mxu0 }
 0x33d   : > { %v590_v53 = vpop.f32.mrb[7].mxu0  ;;  %v599_v55 = vadd.f32 %v962_v52, %v504_v47  ;;  %v604_v57 = vmax.f32 %v596_v50, 0.0 }
 0x33e   : > { %v602_v54 = vmax.f32 %v588_v51, 0.0  ;;  %v591_v56 = vadd.f32 %v590_v53, %v504_v47 }
 0x33f   : > { %v605_v60 = vmax.f32 %v599_v55, 0.0  ;;  %v617_v63 = vmul.f32 %v604_v57, %v604_v57 }
 0x340   : > { %v603_v58 = vmax.f32 %v591_v56, 0.0  ;;  %v615_v59 = vmul.f32 %v602_v54, %v602_v54 }
 0x341   : > { %v618_v2 = vmul.f32 %v605_v60, %v605_v60 }
 0x342   : > { %v606_v61 = vadd.f32 %v603_v58, %v602_v54  ;;  %v616_v62 = vmul.f32 %v603_v58, %v603_v58 }
 0x344   : > { %v607_v0 = vadd.f32 %v606_v61, %v604_v57  ;;  %v619_v1 = vadd.f32 %v616_v62, %v615_v59 }
 0x346   : > { %v608_v3 = vadd.f32 %v607_v0, %v605_v60  ;;  %v620_v4 = vadd.f32 %v619_v1, %v617_v63 }
 0x348   : > { %v609_v5 = vrot.slane %v608_v3, 4  ;;  %v621_v6 = vadd.f32 %v620_v4, %v618_v2 }
 0x34a   : > { %v610_v7 = vadd.f32 %v609_v5, %v608_v3  ;;  %v622_v8 = vrot.slane %v621_v6, 4 }
 0x34c   : > { %v611_v9 = vrot.slane %v610_v7, 2  ;;  %v623_v10 = vadd.f32 %v622_v8, %v621_v6 }
 0x34e   : > { %v612_v11 = vadd.f32 %v611_v9, %v610_v7  ;;  %v624_v12 = vrot.slane %v623_v10, 2 }
 0x350   : > { %v613_v13 = vrot.slane %v612_v11, 1  ;;  %v625_v14 = vadd.f32 %v624_v12, %v623_v10 }
 0x352   : > { %v614_v15 = vadd.f32 %v613_v13, %v612_v11  ;;  %v626_v16 = vrot.slane %v625_v14, 1 }
 0x354   : > { %v627_v17 = vadd.f32 %v626_v16, %v625_v14  ;;  %v628_v18 = vmul.f32 0.03125, %v614_v15 }
 0x356   : > { %v629_v19 = vmul.f32 0.03125, %v627_v17  ;;  %v630_v20 = vmul.f32 %v628_v18, %v628_v18 }
 0x358   : > { %v631_v21 = vsub.f32 %v629_v19, %v630_v20 }
 0x35a   : > { %v632_v22 = vmax.f32 %v631_v21, 0.0 }
 0x35c   : > { %v633_v23 = vadd.f32 1e-05, %v632_v22 }
 0x35e   : > { %1053 = vrsqrt.f32 %v633_v23 }
 0x368   : > { %v1054_v25 = vpop.eup %1053 }
 0x369   : > { %v635_v26 = vmul.f32 %v1054_v25, %v1600_v29 }
 0x36b   : > { %v636_v28 = vmul.f32 %v635_v26, %v628_v18  ;;  %v644_v30 = vrot.slane %v635_v26, %v643_v24 }
 0x36d   : > { %v638_v32 = vrot.slane %v636_v28, 7  ;;  %v646_v33 = vmul.f32 %v644_v30, %v603_v58  ;;  %v645_v34 = vmul.f32 %v644_v30, %v602_v54  ;;  %v647_v35 = vmul.f32 %v644_v30, %v604_v57 }
 0x36e   : > { %v648_v36 = vmul.f32 %v644_v30, %v605_v60 }
 0x36f   : > { %v640_v37 = vsub.f32 %v1600_v29, %v638_v32 }
 0x371   : > { %v652_v38 = vrot.slane %v640_v37, %v651_v31 }
 0x373   : > { %v654_v39 = vadd.f32 %v652_v38, %v646_v33  ;;  %v653_v40 = vadd.f32 %v652_v38, %v645_v34  ;;  %v655_v41 = vadd.f32 %v652_v38, %v647_v35  ;;  %v656_v42 = vadd.f32 %v652_v38, %v648_v36 }
 0x375   : > { %v657_v43 = vpack.c.bf16 %v654_v39, %v653_v40  ;;  %v658_v44 = vpack.c.bf16 %v656_v42, %v655_v41 }
 0x377   : > { %659 = vst [vmem:[#allocation4] sm:$0xff] %v657_v43  ;;  %964 = vmatpush3.bf16.msra.mxu1 %v657_v43  ;;  %660 = vst [vmem:[#allocation4 + $0x8] sm:$0xff] %v658_v44 }
 0x378   : > { %965 = vmatprep.subr.bf16.mxu1 %v1284_v45 }
 0x37b   : > { %966 = vmatpush3.bf16.msra.mxu1 %v658_v44 }
 0x37e   : > { %968 = vmatmul.mubr.msk.bf16.vlgmr.msra.gmra.mrb[4].mxu1 %vm304_vm0, %v661_v27 }
 0x451   : > { %v699_v29 = vpop.f32.mrb[4].mxu1 }
 0x452   : > { %705 = vst [vmem:[%s1564_s7] sm:$0xff] %v699_v29  ;;  %v969_v46 = vpop.f32.mrb[5].mxu1 }
 0x453   : > { %v702_v45 = vpop.f32.mrb[6].mxu1 }
 0x454   : > { %1206 = shalt.err (!%p1203_p9)
}
 0x455   : > { %s1207_s17 = scalar_lea.hbm %s1618_s4, 128  ;;  %s1211_s16 = scalar_lea.hbm %s1668_s6, 384 }
 0x456   : > { %p1208_p5 = scmp.ne.s32.totalorder %s1618_s4, %s1207_s17  ;;  %p1212_p10 = scmp.lt.u32.totalorder %s1618_s4, %s1668_s6 }
 0x457   : > { %p1213_p2 = scmp.lt.u32.totalorder %s1211_s16, %s1207_s17  ;;  %p1215_p13 = scmp.lt.u32.totalorder %s1207_s17, %s1618_s4 }
 0x458   : > { %p1209_p7 = pnand %p1208_p5, %p1700_p1 }
 0x459   : > { %p1214_p8 = por %p1213_p2, %p1212_p10 }
 0x45a   : > { %p1210_p4 = pneg %p1209_p7 }
 0x45b   : > { %p1216_p3 = por %p1215_p13, %p1214_p8 }
 0x45d   : > { %p1217_p6 = pnand %p1216_p3, %p1210_p4 }
 0x45f   : > { %1220 = shalt.err (!%p1217_p6)
}
 0x460   : > { %982 = dma.vmem_to_hbm [thread:$0]  (%p1700_p1), %s1620_s11, 128, %s1618_s4, %s707_s18   ;;  %v970_v47 = vpop.f32.mrb[7].mxu1 }
 0x461 PF: > { %p997_p12 = scmp.ge.s32.totalorder %s1275_s24, 2  ;;  %s732_s14 = sand.u32 1, %s1263_s21  }
 0x462   : > { %p1701_p0 = scmp.ne.s32.totalorder %s1678_s10, 0  ;;  %s733_s7 = scalar_lea.sflag [#allocation8], %s732_s14 }
 0x464   : > { %p992_p11 = pnand %p997_p12, %p1701_p0 }
 0x466   : > { %1258 = dma.done.wait (!%p992_p11), %s733_s7, 128  }
 0x467   : > { %1260 = vsyncadd (!%p992_p11), %s733_s7, 4294967168  ;;  %p22_p9 = scmp.ge.s32.totalorder %s1347_s27, 5   ;;  %s1702_s21 = smov %s1267_s22 }
 0x468   : > { %s1703_s22 = smov %s1271_s23  ;;  %s1704_s23 = smov %s1359_s30 }
 0x469   : > { %s1705_s24 = smov %s1347_s27  ;;  %24 = sbr.rel (!%p22_p9) target bundleno = 10 (0xa), region = 113 }
 0x470   :  { %738 = vsyncpa [#allocation7], 1 }
 0x471   :  { %740 = vsyncpa [#allocation7 + $0x1], 1 }
 0x472   :  { %741 = vsyncpa [#allocation10], 1 }
 0x473   :  { %743 = vsyncpa [#allocation10 + $0x1], 1 }
 0x474   :  { %744 = vsyncpa [#allocation8], 1 }
 0x475   :  { %746 = vsyncpa [#allocation8 + $0x1], 1 }
 0x476   :  { %747 = vsyncmov [#allocation5] }
 0x479   :  { %s748_s24 = vpop.sfrf %747 }
 0x47a   :  { %p883_p1 = scmp.ne.s32.totalorder %s748_s24, 0 }
 0x47c   :  { %752 = shalt.err (%p883_p1)  }
 0x47d   :  { %754 = vsyncmov [#allocation5 + $0x1] }
 0x480   :  { %s755_s9 = vpop.sfrf %754 }
 0x481   :  { %p884_p5 = scmp.ne.s32.totalorder %s755_s9, 0 }
 0x483   :  { %759 = shalt.err (%p884_p5)  }
 0x484   :  { %761 = vsyncmov [#allocation5 + $0x2] }
 0x487   :  { %s762_s10 = vpop.sfrf %761 }
 0x488   :  { %p885_p7 = scmp.ne.s32.totalorder %s762_s10, 0 }
 0x48a   :  { %766 = shalt.err (%p885_p7)  }

</bundles_post_ra>
